<compile_context>
chip_gen: v6e
topology: v6e:2x2x1
jax: 0.10.0
libtpu: 0.0.40
codegen_flags: <defaults>
</compile_context>

<pallas_src>
import math

import jax
import jax.numpy as jnp
from jax import lax
from jax.experimental import pallas as pl
from jax.experimental.pallas import tpu as pltpu

LANE = 128
SUBLANE = 8
FEAT_ALIGN = SUBLANE * LANE                    # 1024 features per (8,128) tile
DEFAULT_BLOCK_FEATURES = SUBLANE * 32768       # 262144 features per grid step


def _padded_features(in_f, block_features):
    """Pad the feature count to a multiple of 1024 (and of the block if tiled)."""
    p = ((in_f + FEAT_ALIGN - 1) // FEAT_ALIGN) * FEAT_ALIGN
    if p > block_features:
        p = ((p + block_features - 1) // block_features) * block_features
    return p


def pack_weight(weight, *, block_features=DEFAULT_BLOCK_FEATURES,
                dtype=jnp.bfloat16):
    """One-time prep of the nn.Linear weight: (4, in_f) f32 -> (4, 8, Kp/8) bf16.

    Do this once per parameter set (it is a constant); the per-call wrapper then
    only touches the activation.
    """
    assert block_features % FEAT_ALIGN == 0
    out_f, in_f = weight.shape
    padded = _padded_features(in_f, block_features)
    if padded != in_f:
        weight = jnp.pad(weight, ((0, 0), (0, padded - in_f)))
    return weight.astype(dtype).reshape(out_f, SUBLANE, padded // SUBLANE)


def _atmos_kernel(x_ref, w_ref, b_ref, o_ref, acc_ref):
    # x_ref  : (8, TK8)      bf16 - sublane-dense activation chunk
    # w_ref  : (4, 8, TK8)   bf16 - sublane-dense weight chunk (native layout)
    # b_ref  : (4, 1)        f32  - bias (resident)
    # o_ref  : (4, 1)        f32  - softmax probabilities (written on last step)
    # acc_ref: (4, 8, 128)   f32  - lane-wide running partial logits
    k = pl.program_id(0)

    @pl.when(k == 0)
    def _():
        acc_ref[...] = jnp.zeros_like(acc_ref)

    tk8 = x_ref.shape[-1]
    nblk = tk8 // LANE                         # static; tk8 is a multiple of 128

    def body(i, acc):
        off = pl.multiple_of(i * LANE, LANE)
        xs = x_ref[:, pl.ds(off, LANE)].astype(jnp.float32)        # (8, 128)
        ws = w_ref[:, :, pl.ds(off, LANE)].astype(jnp.float32)     # (4, 8, 128)
        return acc + ws * xs[None, :, :]                           # VALU only

    unroll = math.gcd(nblk, 8)
    acc_ref[...] = lax.fori_loop(0, nblk, body, acc_ref[...], unroll=unroll)

    @pl.when(k == pl.num_programs(0) - 1)
    def _():
        # Cross-lane / cross-sublane reduce only once, off the per-step path.
        part = jnp.sum(acc_ref[...], axis=2, keepdims=True)        # (4, 8, 1)
        logits = jnp.sum(part, axis=1) + b_ref[...]                # (4, 1)
        m = jnp.max(logits, axis=0, keepdims=True)                 # stable softmax
        e = jnp.exp(logits - m)
        s = jnp.sum(e, axis=0, keepdims=True)
        o_ref[...] = e / s                                         # exact division


def atmos_classifier_packed(x, w_packed, bias,
                            *, block_features=DEFAULT_BLOCK_FEATURES):
    """x: any shape (flattened internally); w_packed: pack_weight() output
    (4, 8, Kp/8) bf16; bias: (4,) f32.  Returns (4,) softmax probabilities."""
    out_f, _, kp = w_packed.shape
    padded = SUBLANE * kp
    in_f = x.size

    # Activation-only per-call prep: flatten, bf16 transport, zero-pad the tail
    # (zeros contribute nothing to the dot), sublane-dense reshape.
    x_flat = x.reshape(-1).astype(w_packed.dtype)
    if padded != in_f:
        x_flat = jnp.pad(x_flat, (0, padded - in_f))
    x2 = x_flat.reshape(SUBLANE, kp)

    tk8 = min(kp, block_features // SUBLANE)       # multiple of 128 by padding
    grid_k = kp // tk8
    bias_col = bias.reshape(out_f, 1).astype(jnp.float32)

    out = pl.pallas_call(
        _atmos_kernel,
        out_shape=jax.ShapeDtypeStruct((out_f, 1), jnp.float32),
        grid_spec=pltpu.PrefetchScalarGridSpec(
            num_scalar_prefetch=0,
            grid=(grid_k,),
            in_specs=[
                pl.BlockSpec((SUBLANE, tk8), lambda k: (0, k)),        # x chunk
                pl.BlockSpec((out_f, SUBLANE, tk8), lambda k: (0, 0, k)),  # w chunk
                pl.BlockSpec((out_f, 1), lambda k: (0, 0)),            # bias
            ],
            out_specs=pl.BlockSpec((out_f, 1), lambda k: (0, 0)),      # resident out
            scratch_shapes=[pltpu.VMEM((out_f, SUBLANE, LANE), jnp.float32)],
        ),
        compiler_params=pltpu.CompilerParams(
            dimension_semantics=("arbitrary",),     # feature-reduction axis
            vmem_limit_bytes=32 * 1024 * 1024,      # safe on v5e/v6e/v7x
        ),
    )(x2, w_packed, bias_col)
    return out[:, 0]                                # (4,)


def atmos_classifier(x, weight, bias, *, block_features=DEFAULT_BLOCK_FEATURES):
    """Convenience wrapper taking the raw nn.Linear weight (4, in_f).
    For repeated use, call pack_weight() once and use atmos_classifier_packed."""
    w_packed = pack_weight(weight, block_features=block_features)
    return atmos_classifier_packed(x, w_packed, bias,
                                   block_features=block_features)


if __name__ == "__main__":
    key = jax.random.PRNGKey(0)
    kx, kw, kb = jax.random.split(key, 3)

    B, C, H, W = 2, 4, 16, 16
    in_f = B * C * H * W                                    # 2048

    x = jax.random.normal(kx, (B, C, H, W), dtype=jnp.float32)
    # Deterministic params matching nn.Linear shapes: (4, in_f), (4,)
    bound = 1.0 / math.sqrt(in_f)
    weight = jax.random.uniform(kw, (4, in_f), jnp.float32, -bound, bound)
    bias = jax.random.uniform(kb, (4,), jnp.float32, -bound, bound)

    # One-time parameter prep (hoisted out of the hot path).
    w_packed = jax.block_until_ready(pack_weight(weight))

    probs = jax.block_until_ready(atmos_classifier_packed(x, w_packed, bias))

    # References.
    x_flat = x.reshape(-1)
    # Full-f32 reference (elementwise, VPU reduction -> no MXU precision games).
    logits_f32 = jnp.sum(weight * x_flat[None, :], axis=1) + bias
    probs_f32 = jax.nn.softmax(logits_f32)
    # bf16-transport-consistent reference (same input quantization as the kernel,
    # f32 accumulation, exact softmax).
    xb = x_flat.astype(jnp.bfloat16).astype(jnp.float32)
    wb = weight.astype(jnp.bfloat16).astype(jnp.float32)
    logits_bf = jnp.sum(wb * xb[None, :], axis=1) + bias
    probs_bf = jax.nn.softmax(logits_bf)

    assert probs.shape == (4,)
    # Tight parity vs the bf16-consistent reference (exact division, f32 accum).
    assert bool(jnp.allclose(probs, probs_bf, atol=1e-4, rtol=1e-4))
    # Looser parity vs the pure-f32 reference (bf16 transport quantization).
    assert bool(jnp.allclose(probs, probs_f32, atol=3e-3, rtol=3e-3))
    assert bool(jnp.allclose(jnp.sum(probs), 1.0, atol=1e-5))

    print("KERNEL_OK")
</pallas_src>

<mosaic_0001>
module attributes {stable_mosaic.version = 11 : i64} {
  func.func @_atmos_kernel(%arg0: i32, %arg1: memref<8x256xbf16, #tpu.memory_space<vmem>>, %arg2: memref<4x8x256xbf16, #tpu.memory_space<vmem>>, %arg3: memref<4x1xf32, #tpu.memory_space<vmem>>, %arg4: memref<4x1xf32, #tpu.memory_space<vmem>>, %arg5: memref<4x8x128xf32, #tpu.memory_space<vmem>>) attributes {dimension_semantics = [#tpu.dimension_semantics<arbitrary>], iteration_bounds = array<i64: 1>, scalar_prefetch = 0 : i64, scratch_operands = 1 : i64, tpu.core_type = #tpu.core_type<tc>, window_params = [{transform_indices = @transform_0, window_bounds = array<i64: 8, 256>}, {transform_indices = @transform_1, window_bounds = array<i64: 4, 8, 256>}, {pipeline_mode = #tpu.pipeline_mode<synchronous>, transform_indices = @transform_2, window_bounds = array<i64: 4, 1>}, {pipeline_mode = #tpu.pipeline_mode<synchronous>, transform_indices = @transform_3, window_bounds = array<i64: 4, 1>}]} {
    %c0_i32 = arith.constant 0 : i32
    %0 = arith.cmpi eq, %arg0, %c0_i32 : i32
    %1 = arith.extui %0 : i1 to i32
    %c0_i32_0 = arith.constant 0 : i32
    %2 = arith.cmpi ne, %1, %c0_i32_0 : i32
    scf.if %2 {
      %cst = arith.constant 0.000000e+00 : f32
      %32 = vector.broadcast %cst : f32 to vector<4x8x128xf32>
      %c0_16 = arith.constant 0 : index
      %c0_17 = arith.constant 0 : index
      %c0_18 = arith.constant 0 : index
      %33 = vector.load %arg5[%c0_16, %c0_17, %c0_18] : memref<4x8x128xf32, #tpu.memory_space<vmem>>, vector<4x8x128xf32>
      tpu.vector_store %arg5[%c0_16, %c0_17, %c0_18], %32 {strides = array<i32>} : memref<4x8x128xf32, #tpu.memory_space<vmem>>, vector<4x8x128xf32>,
    } else {
    }
    %c0 = arith.constant 0 : index
    %c0_1 = arith.constant 0 : index
    %c0_2 = arith.constant 0 : index
    %3 = vector.load %arg5[%c0, %c0_1, %c0_2] : memref<4x8x128xf32, #tpu.memory_space<vmem>>, vector<4x8x128xf32>
    %c0_i32_3 = arith.constant 0 : i32
    %c128_i32 = arith.constant 128 : i32
    %4 = arith.muli %c0_i32_3, %c128_i32 : i32
    %5 = tpu.assume_multiple %4, 128 : i32
    %c0_4 = arith.constant 0 : index
    %6 = arith.index_cast %5 : i32 to index
    %7 = vector.load %arg1[%c0_4, %6] : memref<8x256xbf16, #tpu.memory_space<vmem>>, vector<8x128xbf16>
    %8 = arith.extf %7 : vector<8x128xbf16> to vector<8x128xf32>
    %c0_5 = arith.constant 0 : index
    %c0_6 = arith.constant 0 : index
    %9 = arith.index_cast %5 : i32 to index
    %10 = vector.load %arg2[%c0_5, %c0_6, %9] : memref<4x8x256xbf16, #tpu.memory_space<vmem>>, vector<4x8x128xbf16>
    %11 = arith.extf %10 : vector<4x8x128xbf16> to vector<4x8x128xf32>
    %12 = vector.shape_cast %8 : vector<8x128xf32> to vector<1x8x128xf32>
    %13 = vector.broadcast %12 : vector<1x8x128xf32> to vector<4x8x128xf32>
    %14 = arith.mulf %11, %13 : vector<4x8x128xf32>
    %15 = arith.addf %3, %14 : vector<4x8x128xf32>
    %c1_i32 = arith.constant 1 : i32
    %c128_i32_7 = arith.constant 128 : i32
    %16 = arith.muli %c1_i32, %c128_i32_7 : i32
    %17 = tpu.assume_multiple %16, 128 : i32
    %c0_8 = arith.constant 0 : index
    %18 = arith.index_cast %17 : i32 to index
    %19 = vector.load %arg1[%c0_8, %18] : memref<8x256xbf16, #tpu.memory_space<vmem>>, vector<8x128xbf16>
    %20 = arith.extf %19 : vector<8x128xbf16> to vector<8x128xf32>
    %c0_9 = arith.constant 0 : index
    %c0_10 = arith.constant 0 : index
    %21 = arith.index_cast %17 : i32 to index
    %22 = vector.load %arg2[%c0_9, %c0_10, %21] : memref<4x8x256xbf16, #tpu.memory_space<vmem>>, vector<4x8x128xbf16>
    %23 = arith.extf %22 : vector<4x8x128xbf16> to vector<4x8x128xf32>
    %24 = vector.shape_cast %20 : vector<8x128xf32> to vector<1x8x128xf32>
    %25 = vector.broadcast %24 : vector<1x8x128xf32> to vector<4x8x128xf32>
    %26 = arith.mulf %23, %25 : vector<4x8x128xf32>
    %27 = arith.addf %15, %26 : vector<4x8x128xf32>
    %c2_i32 = arith.constant 2 : i32
    %c0_11 = arith.constant 0 : index
    %c0_12 = arith.constant 0 : index
    %c0_13 = arith.constant 0 : index
    %28 = vector.load %arg5[%c0_11, %c0_12, %c0_13] : memref<4x8x128xf32, #tpu.memory_space<vmem>>, vector<4x8x128xf32>
    tpu.vector_store %arg5[%c0_11, %c0_12, %c0_13], %27 {strides = array<i32>} : memref<4x8x128xf32, #tpu.memory_space<vmem>>, vector<4x8x128xf32>,
    %c0_i32_14 = arith.constant 0 : i32
    %29 = arith.cmpi eq, %arg0, %c0_i32_14 : i32
    %30 = arith.extui %29 : i1 to i32
    %c0_i32_15 = arith.constant 0 : i32
    %31 = arith.cmpi ne, %30, %c0_i32_15 : i32
    scf.if %31 {
      %c0_16 = arith.constant 0 : index
      %c0_17 = arith.constant 0 : index
      %c0_18 = arith.constant 0 : index
      %32 = vector.load %arg5[%c0_16, %c0_17, %c0_18] : memref<4x8x128xf32, #tpu.memory_space<vmem>>, vector<4x8x128xf32>
      %cst = arith.constant dense<0.000000e+00> : vector<4x8xf32>
      %33 = vector.multi_reduction <add>, %32, %cst [2] : vector<4x8x128xf32> to vector<4x8xf32>
      %34 = vector.shape_cast %33 : vector<4x8xf32> to vector<4x8x1xf32>
      %cst_19 = arith.constant dense<0.000000e+00> : vector<4x1xf32>
      %35 = vector.multi_reduction <add>, %34, %cst_19 [1] : vector<4x8x1xf32> to vector<4x1xf32>
      %c0_20 = arith.constant 0 : index
      %c0_21 = arith.constant 0 : index
      %36 = vector.load %arg3[%c0_20, %c0_21] : memref<4x1xf32, #tpu.memory_space<vmem>>, vector<4x1xf32>
      %37 = arith.addf %35, %36 : vector<4x1xf32>
      %cst_22 = arith.constant dense<0xFF800000> : vector<1xf32>
      %38 = vector.multi_reduction <maximumf>, %37, %cst_22 [0] : vector<4x1xf32> to vector<1xf32>
      %39 = vector.shape_cast %38 : vector<1xf32> to vector<1x1xf32>
      %40 = vector.broadcast %39 : vector<1x1xf32> to vector<4x1xf32>
      %41 = arith.subf %37, %40 : vector<4x1xf32>
      %42 = math.exp %41 : vector<4x1xf32>
      %cst_23 = arith.constant dense<0.000000e+00> : vector<1xf32>
      %43 = vector.multi_reduction <add>, %42, %cst_23 [0] : vector<4x1xf32> to vector<1xf32>
      %44 = vector.shape_cast %43 : vector<1xf32> to vector<1x1xf32>
      %45 = vector.broadcast %44 : vector<1x1xf32> to vector<4x1xf32>
      %46 = arith.divf %42, %45 : vector<4x1xf32>
      %c0_24 = arith.constant 0 : index
      %c0_25 = arith.constant 0 : index
      %47 = vector.load %arg4[%c0_24, %c0_25] : memref<4x1xf32, #tpu.memory_space<vmem>>, vector<4x1xf32>
      tpu.vector_store %arg4[%c0_24, %c0_25], %46 {strides = array<i32>} : memref<4x1xf32, #tpu.memory_space<vmem>>, vector<4x1xf32>,
    } else {
    }
    return
  }
  func.func @transform_0(%arg0: i32) -> (i32, i32) {
    %c0_i32 = arith.constant 0 : i32
    %c0_i32_0 = arith.constant 0 : i32
    return %c0_i32, %arg0 : i32, i32
  }
  func.func @transform_1(%arg0: i32) -> (i32, i32, i32) {
    %c0_i32 = arith.constant 0 : i32
    %c0_i32_0 = arith.constant 0 : i32
    %c0_i32_1 = arith.constant 0 : i32
    return %c0_i32, %c0_i32_0, %arg0 : i32, i32, i32
  }
  func.func @transform_2(%arg0: i32) -> (i32, i32) {
    %c0_i32 = arith.constant 0 : i32
    %c0_i32_0 = arith.constant 0 : i32
    %c0_i32_1 = arith.constant 0 : i32
    return %c0_i32, %c0_i32_0 : i32, i32
  }
  func.func @transform_3(%arg0: i32) -> (i32, i32) {
    %c0_i32 = arith.constant 0 : i32
    %c0_i32_0 = arith.constant 0 : i32
    %c0_i32_1 = arith.constant 0 : i32
    return %c0_i32, %c0_i32_0 : i32, i32
  }
}

</mosaic_0001>

<bundles_post_ra>
// kernel: tpu_custom_call.1
= control target key start
LH: loop header
LB: loop body
LE: loop exit
PB: predicated region body
PF: predicated region fallthrough
CT: control target
= control target key end

     0   :  { %8 = vsyncpa [#allocation4], 0  ;;  %s321_s0 = inlined_call_operand.hbm [shape: bf16[8,256], index: 0, kind: input, shape index: {}]   ;;  %s322_s1 = inlined_call_operand.hbm [shape: bf16[4,8,256], index: 1, kind: input, shape index: {}]   ;;  %s323_s2 = inlined_call_operand.vmem [shape: f32[4,1], index: 2, kind: input, shape index: {}]   ;;  %s324_s3 = inlined_call_operand.vmem [shape: f32[4,1], index: 3, kind: output, shape index: {}]  }
   0x1   :  { %9 = vsyncpa [#allocation6], 0  ;;  %s277_s12 = smov [#allocation3]   ;;  %s278_s14 = smov [#allocation5]  }
   0x2   :  { %s16_s13 = sshll.u32 %s277_s12, 4  ;;  %s25_s15 = sshll.u32 %s278_s14, 4  ;;  %s17_s13 = int_to_ptr.vmem [resolvable:$true] %s16_s13  ;;  %s26_s15 = int_to_ptr.vmem [resolvable:$true] %s25_s15 }
   0x3   :  { %s241_s16 = scalar_lea.vmem %s17_s13, 128  ;;  %p246_p1 = scmp.lt.s32.totalorder %s17_s13, %s17_s13 }
   0x4   :  { %p242_p0 = scmp.ne.s32.totalorder %s17_s13, %s241_s16  ;;  %p247_p2 = scmp.lt.s32.totalorder %s241_s16, %s241_s16 }
   0x6   :  { %p248_p3 = por %p247_p2, %p246_p1 }
   0x8   :  { %p249_p4 = pnand %p248_p3, %p242_p0 }
   0xa   :  { %252 = shalt.err (!%p249_p4)
}
   0xb   :  { %19 = dma.hbm_to_vmem [thread:$0]  %s321_s0, 128, %s17_s13, [#allocation4]  }
   0xc   :  { %s261_s19 = scalar_lea.vmem %s26_s15, 512  ;;  %p266_p6 = scmp.lt.s32.totalorder %s26_s15, %s26_s15 }
   0xd   :  { %p262_p5 = scmp.ne.s32.totalorder %s26_s15, %s261_s19  ;;  %p267_p7 = scmp.lt.s32.totalorder %s261_s19, %s261_s19 }
   0xf   :  { %p268_p8 = por %p267_p7, %p266_p6 }
  0x11   :  { %p269_p9 = pnand %p268_p8, %p262_p5 }
  0x13   :  { %272 = shalt.err (!%p269_p9)
}
  0x14   :  { %s279_s20 = smov 128   ;;  %s280_s21 = smov 8  }
  0x15   :  { %31 = dma.hbm_to_vmem [thread:$0]  %s322_s1, 512, %s26_s15, [#allocation6], %s279_s20, %s279_s20, %s280_s21  }
  0x16   :  { %273 = dma.done.wait [#allocation4], 128  }
  0x17   :  { %274 = vsyncadd [#allocation4], 4294967168 }
  0x18   :  { %275 = dma.done.wait [#allocation6], 512  }
  0x19   :  { %276 = vsyncadd [#allocation6], 4294966784  ;;  %v52_v0 = vld [vmem:[#allocation3] sm:$0xff]   ;;  %v56_v1 = vld [vmem:[#allocation5 + $0x10] sm:$0xff]   ;;  %v154_v55 = vlaneseq  ;;  %vm146_vm0 = vcmask 0   ;;  %vm175_vm1 = vcmask 1041409  }
  0x1a   :  { %v54_v2 = vld [vmem:[#allocation5] sm:$0xff]   ;;  %v53_v3 = vunpack.c.l.bf16 %v52_v0  ;;  %v60_v4 = vunpack.c.l.bf16 %v56_v1  ;;  %v72_v5 = vunpack.c.h.bf16 %v52_v0  ;;  %v80_v6 = vunpack.c.h.bf16 %v56_v1  ;;  %v57_v7 = vld [vmem:[#allocation5 + $0x18] sm:$0xff]   ;;  %v55_v8 = vld [vmem:[#allocation5 + $0x8] sm:$0xff]  }
  0x1b   :  { %v58_v9 = vunpack.c.l.bf16 %v54_v2  ;;  %v78_v10 = vunpack.c.h.bf16 %v54_v2  ;;  %v61_v11 = vunpack.c.l.bf16 %v57_v7  ;;  %v81_v12 = vunpack.c.h.bf16 %v57_v7  ;;  %v133_v41 = vld [vmem:[%s323_s2] sm:$0xf] }
  0x1c   :  { %v64_v13 = vmul.f32 %v60_v4, %v53_v3  ;;  %v84_v14 = vmul.f32 %v80_v6, %v72_v5  ;;  %v59_v15 = vunpack.c.l.bf16 %v55_v8  ;;  %v79_v16 = vunpack.c.h.bf16 %v55_v8 }
  0x1d   :  { %v62_v17 = vmul.f32 %v58_v9, %v53_v3  ;;  %v82_v18 = vmul.f32 %v78_v10, %v72_v5  ;;  %v65_v19 = vmul.f32 %v61_v11, %v53_v3  ;;  %v85_v20 = vmul.f32 %v81_v12, %v72_v5 }
  0x1e   :  { %v88_v21 = vadd.f32 %v84_v14, %v64_v13  ;;  %v63_v22 = vmul.f32 %v59_v15, %v53_v3  ;;  %v83_v23 = vmul.f32 %v79_v16, %v72_v5  ;;  %v136_v48 = vrot.slane %v133_v41, 2 }
  0x1f   :  { %v86_v24 = vadd.f32 %v82_v18, %v62_v17  ;;  %v89_v25 = vadd.f32 %v85_v20, %v65_v19  ;;  %v137_v53 = vrot.slane %v133_v41, 3  ;;  %v135_v56 = vrot.slane %v133_v41, 1 }
  0x20   :  { %105 = vadd.xlane.f32.xlu1 %v88_v21  ;;  %v87_v26 = vadd.f32 %v83_v23, %v63_v22  ;;  %v155_v63 = vshrl.u32 %v154_v55, 7  ;;  %vm178_vm2 = vcmask 1042434   ;;  %vm181_vm3 = vcmask 1043459  }
  0x21   :  { %101 = vadd.xlane.f32.xlu0 %v86_v24  ;;  %vm184_vm4 = vcmask 3072  }
  0x22   :  { %v156_v6 = vsub.s32 0, %v155_v63 }
  0x24   :  { %107 = vadd.xlane.f32.xlu1 %v89_v25 }
  0x25   :  { %103 = vadd.xlane.f32.xlu0 %v87_v26 }
  0xa9   :  { %v106_v27 = vpop.xlane.xlu1 %105 }
  0xaa   :  { %v121_v28 = vrot.slane %v106_v27, 4  ;;  %v102_v29 = vpop.xlane.xlu0 %101 }
  0xab   :  { %v109_v30 = vrot.slane %v102_v29, 4 }
  0xac   :  { %v122_v31 = vadd.f32 %v121_v28, %v106_v27 }
  0xad   :  { %v110_v32 = vadd.f32 %v109_v30, %v102_v29  ;;  %v108_v33 = vpop.xlane.xlu1 %107 }
  0xae   :  { %v123_v34 = vrot.slane %v122_v31, 2  ;;  %v127_v35 = vrot.slane %v108_v33, 4  ;;  %v104_v36 = vpop.xlane.xlu0 %103 }
  0xaf   :  { %v111_v37 = vrot.slane %v110_v32, 2  ;;  %v115_v38 = vrot.slane %v104_v36, 4 }
  0xb0   :  { %v124_v39 = vadd.f32 %v123_v34, %v122_v31  ;;  %v128_v40 = vadd.f32 %v127_v35, %v108_v33 }
  0xb1   :  { %v112_v42 = vadd.f32 %v111_v37, %v110_v32  ;;  %v116_v43 = vadd.f32 %v115_v38, %v104_v36 }
  0xb2   :  { %v125_v44 = vrot.slane %v124_v39, 1  ;;  %v129_v45 = vrot.slane %v128_v40, 2 }
  0xb3   :  { %v113_v46 = vrot.slane %v112_v42, 1  ;;  %v117_v47 = vrot.slane %v116_v43, 2 }
  0xb4   :  { %v126_v49 = vadd.f32 %v125_v44, %v124_v39  ;;  %v130_v50 = vadd.f32 %v129_v45, %v128_v40 }
  0xb5   :  { %v114_v51 = vadd.f32 %v113_v46, %v112_v42  ;;  %v118_v52 = vadd.f32 %v117_v47, %v116_v43 }
  0xb6   :  { %v131_v54 = vrot.slane %v130_v50, 1  ;;  %v144_v58 = vadd.f32 %v136_v48, %v126_v49 }
  0xb7   :  { %v119_v57 = vrot.slane %v118_v52, 1  ;;  %v142_v60 = vadd.f32 %v133_v41, %v114_v51 }
  0xb8   :  { %v132_v59 = vadd.f32 %v131_v54, %v130_v50  ;;  %v149_v1 = vsel %vm146_vm0, %v144_v58, -inf }
  0xb9   :  { %v120_v61 = vadd.f32 %v119_v57, %v118_v52  ;;  %v147_v3 = vsel %vm146_vm0, %v142_v60, -inf }
  0xba   :  { %v145_v62 = vadd.f32 %v137_v53, %v132_v59 }
  0xbb   :  { %v143_v0 = vadd.f32 %v135_v56, %v120_v61 }
  0xbc   :  { %v150_v2 = vsel %vm146_vm0, %v145_v62, -inf }
  0xbd   :  { %v152_v4 = vmax.f32 %v149_v1, %v150_v2  ;;  %v148_v5 = vsel %vm146_vm0, %v143_v0, -inf }
  0xbe   :  { %v151_v7 = vmax.f32 %v147_v3, %v148_v5 }
  0xc0   :  { %v153_v8 = vmax.f32 %v151_v7, %v152_v4 }
  0xc2   :  { %v157_v9 = vrot.slane %v153_v8, %v156_v6 }
  0xc4   :  { %v158_v10 = vsub.f32 %v142_v60, %v157_v9  ;;  %v159_v11 = vsub.f32 %v143_v0, %v157_v9  ;;  %v160_v12 = vsub.f32 %v144_v58, %v157_v9  ;;  %v161_v13 = vsub.f32 %v145_v62, %v157_v9 }
  0xc6   :  { %v162_v14 = vmul.f32 1.442695, %v158_v10  ;;  %v164_v15 = vmul.f32 1.442695, %v159_v11  ;;  %v166_v16 = vmul.f32 1.442695, %v160_v12 }
  0xc7   :  { %v168_v17 = vmul.f32 1.442695, %v161_v13 }
  0xc8   :  { %223 = vpow2.f32 %v162_v14 }
  0xc9   :  { %225 = vpow2.f32 %v164_v15 }
  0xca   :  { %227 = vpow2.f32 %v166_v16 }
  0xcb   :  { %229 = vpow2.f32 %v168_v17 }
  0xd5   :  { %v224_v18 = vpop.eup %223 }
  0xd6   :  { %v226_v19 = vpop.eup %225 }
  0xd7   :  { %v228_v20 = vpop.eup %227  ;;  %v174_v21 = vrot.slane %v226_v19, 7 }
  0xd8   :  { %v230_v22 = vpop.eup %229  ;;  %v177_v23 = vrot.slane %v228_v20, 6 }
  0xd9   :  { %v176_v24 = vsel %vm175_vm1, %v174_v21, %v224_v18  ;;  %v180_v25 = vrot.slane %v230_v22, 5 }
  0xda   :  { %v179_v26 = vsel %vm178_vm2, %v177_v23, %v176_v24 }
  0xdb   :  { %v182_v27 = vsel %vm181_vm3, %v180_v25, %v179_v26 }
  0xdc   :  { %v185_v28 = vsel %vm184_vm4, %v182_v27, 0.0 }
  0xdd   :  { %v186_v29 = vrot.slane %v185_v28, 4 }
  0xdf   :  { %v187_v30 = vadd.f32 %v186_v29, %v185_v28 }
  0xe1   :  { %v188_v31 = vrot.slane %v187_v30, 2 }
  0xe3   :  { %v189_v32 = vadd.f32 %v188_v31, %v187_v30 }
  0xe5   :  { %v190_v33 = vrot.slane %v189_v32, 1 }
  0xe7   :  { %v191_v34 = vadd.f32 %v190_v33, %v189_v32 }
  0xe9   :  { %v195_v35 = vrot.slane %v191_v34, %v156_v6 }
  0xeb   :  { %231 = vrcp.f32 %v195_v35 }
  0xf8   :  { %v232_v36 = vpop.eup %231 }
  0xf9   :  { %v198_v37 = vmul.f32 %v232_v36, %v226_v19  ;;  %v199_v38 = vmul.f32 %v232_v36, %v228_v20  ;;  %v200_v39 = vmul.f32 %v232_v36, %v230_v22  ;;  %v197_v40 = vmul.f32 %v232_v36, %v224_v18 }
  0xfb   :  { %v205_v41 = vrot.slane %v198_v37, 7  ;;  %v207_v42 = vrot.slane %v199_v38, 6  ;;  %v209_v44 = vrot.slane %v200_v39, 5 }
  0xfd   :  { %v206_v43 = vsel %vm175_vm1, %v205_v41, %v197_v40 }
  0xfe   :  { %v208_v45 = vsel %vm178_vm2, %v207_v42, %v206_v43 }
  0xff   :  { %v210_v46 = vsel %vm181_vm3, %v209_v44, %v208_v45 }
 0x100   :  { %212 = vst.msk [vmem:[%s324_s3] sm:$0xf] %vm184_vm4, %v210_v46 }
 0x101   :  { %217 = vsyncpa [#allocation4], 1 }
 0x102   :  { %218 = vsyncpa [#allocation6], 1 }

</bundles_post_ra>
